<compile_context>
chip_gen: v5e
topology: v5e:2x2
jax: 0.10.0
libtpu: 0.0.40
codegen_flags: <defaults>
</compile_context>

<pallas_src>
import jax
import jax.numpy as jnp
from jax.experimental import pallas as pl
from jax.experimental.pallas import tpu as pltpu

IN_FEATURES = 16
OUT_FEATURES = 8
FOLD = 16                       # batch rows folded into the lane axis
FIN = FOLD * IN_FEATURES        # 256 folded input lanes
FOUT = FOLD * OUT_FEATURES      # 128 folded output lanes
ONE_SIXTH = 1.0 / 6.0


def linear_hardswish_kernel(x_ref, w_ref, b_ref, o_ref):
    x = x_ref[...]                               # (tbf, 256) folded rows
    w = w_ref[...]                               # (256, 128) block-diagonal
    b = b_ref[...].astype(jnp.float32)           # (1, 128)   tiled bias
    v1 = jnp.dot(x, w, preferred_element_type=jnp.float32) + b
    # hard-swish: v1 * clamp(v1 + 3, 0, 6) * (1/6)   (constant mul, no div)
    v2 = v1 * jnp.clip(v1 + 3.0, 0.0, 6.0) * ONE_SIXTH
    o_ref[...] = v2.astype(o_ref.dtype)


def linear_hardswish(x, w, b, *, tbf=2048, xla_fallback_rows=0):
    """x: (B, 16), w: (16, 8), b: (8,) -> (B, 8)."""
    B = x.shape[0]
    if B <= xla_fallback_rows:
        # Tiny batches: a fused XLA op beats any kernel launch (feedback item).
        v1 = jnp.dot(x, w, preferred_element_type=jnp.float32) + b
        return (v1 * jnp.clip(v1 + 3.0, 0.0, 6.0) * ONE_SIXTH).astype(x.dtype)

    # Pad batch so the folded row count is a multiple of 8 (sublane granule).
    pad_to = FOLD * 8
    Bp = ((B + pad_to - 1) // pad_to) * pad_to
    if Bp != B:
        x = jnp.pad(x, ((0, Bp - B), (0, 0)))
    Bf = Bp // FOLD
    xf = x.reshape(Bf, FIN)                           # free row-major reshape

    # Block-diagonal weight (256,128): 16 copies of w on the diagonal; bias
    # tiled 16x to width 128.  Both stay resident in VMEM (constant block idx).
    w_bd = jnp.kron(jnp.eye(FOLD, dtype=w.dtype), w)  # (FIN, FOUT)
    b_t = jnp.tile(b, FOLD).reshape(1, FOUT)          # (1, FOUT)

    # Tile selection: big tiles (HBM-bound, not overhead-bound), multiple of 8,
    # and >= 2 grid steps whenever possible so v7x uses both TensorCores.
    tbf = min(int(tbf), Bf)
    if Bf >= 16 and tbf > Bf // 2:
        tbf = Bf // 2
    tbf = max(8, (tbf // 8) * 8)
    grid = (pl.cdiv(Bf, tbf),)

    out_f = pl.pallas_call(
        linear_hardswish_kernel,
        out_shape=jax.ShapeDtypeStruct((Bf, FOUT), x.dtype),
        grid=grid,
        in_specs=[
            # streamed, lane-dense batch tile
            pl.BlockSpec((tbf, FIN), lambda i: (i, 0)),
            # weight + bias resident (same block every step -> single DMA)
            pl.BlockSpec((FIN, FOUT), lambda i: (0, 0)),
            pl.BlockSpec((1, FOUT), lambda i: (0, 0)),
        ],
        out_specs=pl.BlockSpec((tbf, FOUT), lambda i: (i, 0)),
        compiler_params=pltpu.CompilerParams(
            dimension_semantics=("parallel",),
            # ~5x the double-buffered tile footprint; safe on v5e/v6e/v7x.
            vmem_limit_bytes=32 * 1024 * 1024,
        ),
    )(xf, w_bd, b_t)

    out = out_f.reshape(Bp, OUT_FEATURES)             # free reshape back
    if Bp != B:
        out = out[:B]
    return out


def _reference(x, w, b):
    v1 = x @ w + b
    return v1 * jnp.clip(v1 + 3.0, 0.0, 6.0) / 6.0


if __name__ == "__main__":
    key = jax.random.PRNGKey(0)
    kx, kw, kb, kx2, kx3 = jax.random.split(key, 5)

    # Module input: x1 = torch.randn(1, 16)
    x1 = jax.random.normal(kx, (1, IN_FEATURES), dtype=jnp.float32)

    # Deterministic parameter init (nn.Linear(16, 8) shapes).
    bound = 1.0 / (IN_FEATURES ** 0.5)
    w_out_in = jax.random.uniform(
        kw, (OUT_FEATURES, IN_FEATURES), minval=-bound, maxval=bound,
        dtype=jnp.float32)
    bias = jax.random.uniform(
        kb, (OUT_FEATURES,), minval=-bound, maxval=bound, dtype=jnp.float32)
    w = w_out_in.T  # (IN, OUT) layout for the kernel

    # --- spec-sized run (B = 1): forced through the kernel (padded fold) ---
    out = jax.block_until_ready(linear_hardswish(x1, w, bias))
    ref = _reference(x1, w, bias)
    assert out.shape == (1, OUT_FEATURES)
    assert jnp.allclose(out, ref, atol=2e-5, rtol=1e-5), (out, ref)

    # --- tiled / pipelined path with >= 2 grid steps ---
    x_big = jax.random.normal(kx2, (4096, IN_FEATURES), dtype=jnp.float32)
    out_big = jax.block_until_ready(linear_hardswish(x_big, w, bias))
    ref_big = _reference(x_big, w, bias)
    assert jnp.allclose(out_big, ref_big, atol=1e-4, rtol=1e-4)

    # --- non-multiple-of-fold batch (padding + slice path) ---
    x_odd = jax.random.normal(kx3, (1000, IN_FEATURES), dtype=jnp.float32)
    out_odd = jax.block_until_ready(linear_hardswish(x_odd, w, bias))
    ref_odd = _reference(x_odd, w, bias)
    assert jnp.allclose(out_odd, ref_odd, atol=1e-4, rtol=1e-4)

    print("KERNEL_OK")
</pallas_src>

<mosaic_0001>
module attributes {stable_mosaic.version = 11 : i64} {
  func.func @linear_hardswish_kernel(%arg0: i32, %arg1: memref<8x256xf32, #tpu.memory_space<vmem>>, %arg2: memref<256x128xf32, #tpu.memory_space<vmem>>, %arg3: memref<1x128xf32, #tpu.memory_space<vmem>>, %arg4: memref<8x128xf32, #tpu.memory_space<vmem>>) attributes {dimension_semantics = [#tpu.dimension_semantics<parallel>], iteration_bounds = array<i64: 1>, scalar_prefetch = 0 : i64, scratch_operands = 0 : i64, tpu.core_type = #tpu.core_type<tc>, window_params = [{transform_indices = @transform_0, window_bounds = array<i64: 8, 256>}, {pipeline_mode = #tpu.pipeline_mode<synchronous>, transform_indices = @transform_1, window_bounds = array<i64: 256, 128>}, {pipeline_mode = #tpu.pipeline_mode<synchronous>, transform_indices = @transform_2, window_bounds = array<i64: 1, 128>}, {transform_indices = @transform_3, window_bounds = array<i64: 8, 128>}]} {
    %c0 = arith.constant 0 : index
    %c0_0 = arith.constant 0 : index
    %0 = vector.load %arg1[%c0, %c0_0] : memref<8x256xf32, #tpu.memory_space<vmem>>, vector<8x256xf32>
    %c0_1 = arith.constant 0 : index
    %c0_2 = arith.constant 0 : index
    %1 = vector.load %arg2[%c0_1, %c0_2] : memref<256x128xf32, #tpu.memory_space<vmem>>, vector<256x128xf32>
    %c0_3 = arith.constant 0 : index
    %c0_4 = arith.constant 0 : index
    %2 = vector.load %arg3[%c0_3, %c0_4] : memref<1x128xf32, #tpu.memory_space<vmem>>, vector<1x128xf32>
    %cst = arith.constant dense<0.000000e+00> : vector<8x128xf32>
    %3 = tpu.matmul %0, %1, %cst {dimension_numbers = #tpu.dot_dimension_numbers<[1], [0], [0], [1], [0, 0, 1, 1], [], []>} : vector<8x256xf32>, vector<256x128xf32>, vector<8x128xf32> -> vector<8x128xf32>
    %4 = vector.broadcast %2 : vector<1x128xf32> to vector<8x128xf32>
    %5 = arith.addf %3, %4 : vector<8x128xf32>
    %cst_5 = arith.constant 3.000000e+00 : f32
    %6 = vector.broadcast %cst_5 : f32 to vector<8x128xf32>
    %7 = arith.addf %5, %6 : vector<8x128xf32>
    %cst_6 = arith.constant 0.000000e+00 : f32
    %cst_7 = arith.constant 6.000000e+00 : f32
    %8 = vector.broadcast %cst_6 : f32 to vector<8x128xf32>
    %9 = arith.maximumf %8, %7 : vector<8x128xf32>
    %10 = vector.broadcast %cst_7 : f32 to vector<8x128xf32>
    %11 = arith.minimumf %10, %9 : vector<8x128xf32>
    %12 = arith.mulf %5, %11 : vector<8x128xf32>
    %cst_8 = arith.constant 0.166666672 : f32
    %13 = vector.broadcast %cst_8 : f32 to vector<8x128xf32>
    %14 = arith.mulf %12, %13 : vector<8x128xf32>
    %c0_9 = arith.constant 0 : index
    %c0_10 = arith.constant 0 : index
    %15 = vector.load %arg4[%c0_9, %c0_10] : memref<8x128xf32, #tpu.memory_space<vmem>>, vector<8x128xf32>
    tpu.vector_store %arg4[%c0_9, %c0_10], %14 {strides = array<i32>} : memref<8x128xf32, #tpu.memory_space<vmem>>, vector<8x128xf32>,
    return
  }
  func.func @transform_0(%arg0: i32) -> (i32, i32) {
    %c0_i32 = arith.constant 0 : i32
    %c0_i32_0 = arith.constant 0 : i32
    return %arg0, %c0_i32 : i32, i32
  }
  func.func @transform_1(%arg0: i32) -> (i32, i32) {
    %c0_i32 = arith.constant 0 : i32
    %c0_i32_0 = arith.constant 0 : i32
    %c0_i32_1 = arith.constant 0 : i32
    return %c0_i32, %c0_i32_0 : i32, i32
  }
  func.func @transform_2(%arg0: i32) -> (i32, i32) {
    %c0_i32 = arith.constant 0 : i32
    %c0_i32_0 = arith.constant 0 : i32
    %c0_i32_1 = arith.constant 0 : i32
    return %c0_i32, %c0_i32_0 : i32, i32
  }
  func.func @transform_3(%arg0: i32) -> (i32, i32) {
    %c0_i32 = arith.constant 0 : i32
    %c0_i32_0 = arith.constant 0 : i32
    return %arg0, %c0_i32 : i32, i32
  }
}

</mosaic_0001>

<bundles_post_ra>
// kernel: tpu_custom_call.1
= control target key start
LH: loop header
LB: loop body
LE: loop exit
PB: predicated region body
PF: predicated region fallthrough
CT: control target
= control target key end

     0   :  { %8 = vsyncpa [#allocation3], 0  ;;  %s268_s0 = inlined_call_operand.hbm [shape: f32[8,256], index: 0, kind: input, shape index: {}]   ;;  %s269_s1 = inlined_call_operand.hbm [shape: f32[256,128], index: 1, kind: input, shape index: {}]   ;;  %s270_s2 = inlined_call_operand.vmem [shape: f32[1,128], index: 2, kind: input, shape index: {}]   ;;  %s271_s3 = inlined_call_operand.hbm [shape: f32[8,128], index: 3, kind: output, shape index: {}]  }
   0x1   :  { %9 = vsyncpa [#allocation6], 0 }
   0x2   :  { %10 = vsyncpa [#allocation4], 0  ;;  %s16_s14 = sshll.u32 %s268_s0, 4  ;;  %s231_s15 = smov [#allocation2]   ;;  %s17_s14 = int_to_ptr.hbm [resolvable:$true] %s16_s14 }
   0x3   :  { %s18_s16 = sshll.u32 %s231_s15, 4  ;;  %s26_s19 = sshll.u32 %s269_s1, 4  ;;  %s19_s16 = int_to_ptr.vmem [resolvable:$true] %s18_s16  ;;  %s27_s19 = int_to_ptr.hbm [resolvable:$true] %s26_s19 }
   0x4   :  { %21 = dma.hbm_to_vmem [thread:$0]  %s17_s14, 256, %s19_s16, [#allocation3]  }
   0x5   :  { %s232_s20 = smov [#allocation5]   ;;  %s233_s22 = smov 128  }
   0x6   :  { %s28_s21 = sshll.u32 %s232_s20, 4  ;;  %s234_s23 = smov 8   ;;  %s29_s21 = int_to_ptr.vmem [resolvable:$true] %s28_s21 }
   0x7   :  { %34 = dma.hbm_to_vmem [thread:$0]  %s27_s19, 4096, %s29_s21, [#allocation6], %s233_s22, %s233_s22, %s234_s23  }
   0x8   :  { %225 = dma.done.wait [#allocation3], 256  }
   0x9   :  { %226 = vsyncadd [#allocation3], 4294967040 }
   0xa   :  { %227 = dma.done.wait [#allocation6], 4096  }
   0xb   :  { %228 = vsyncadd [#allocation6], 4294963200  ;;  %v62_v0 = vld [vmem:[#allocation5 + $0x78] sm:$0xff]  ;;  %v61_v1 = vld [vmem:[#allocation5 + $0x70] sm:$0xff]  ;;  %s235_s24 = smov [#allocation7]   ;;  %s136_s28 = sshll.u32 %s271_s3, 4  ;;  %s137_s28 = int_to_ptr.hbm [resolvable:$true] %s136_s28 }
   0xc   :  { %v78_v2 = vld [vmem:[#allocation5 + $0xf8] sm:$0xff]  ;;  %83 = vmatpush.msra.mxu0 %v62_v0  ;;  %v77_v3 = vld [vmem:[#allocation5 + $0xf0] sm:$0xff]  ;;  %v60_v4 = vld [vmem:[#allocation5 + $0x68] sm:$0xff]  ;;  %s134_s25 = sshll.u32 %s235_s24, 4  ;;  %s135_s25 = int_to_ptr.vmem [resolvable:$true] %s134_s25 }
   0xd   :  { %103 = vmatpush.msra.mxu1 %v78_v2  ;;  %v76_v5 = vld [vmem:[#allocation5 + $0xe8] sm:$0xff]  ;;  %v59_v6 = vld [vmem:[#allocation5 + $0x60] sm:$0xff]  ;;  %v58_v8 = vld [vmem:[#allocation5 + $0x58] sm:$0xff] }
   0xe   :  { %84 = vmatpush.msra.mxu0 %v61_v1  ;;  %v75_v7 = vld [vmem:[#allocation5 + $0xe0] sm:$0xff]  ;;  %v74_v9 = vld [vmem:[#allocation5 + $0xd8] sm:$0xff]  ;;  %v57_v10 = vld [vmem:[#allocation5 + $0x50] sm:$0xff] }
   0xf   :  { %104 = vmatpush.msra.mxu1 %v77_v3  ;;  %v73_v11 = vld [vmem:[#allocation5 + $0xd0] sm:$0xff]  ;;  %v56_v12 = vld [vmem:[#allocation5 + $0x48] sm:$0xff]  ;;  %v55_v14 = vld [vmem:[#allocation5 + $0x40] sm:$0xff] }
  0x10   :  { %85 = vmatpush.msra.mxu0 %v60_v4  ;;  %v72_v13 = vld [vmem:[#allocation5 + $0xc8] sm:$0xff]  ;;  %v71_v15 = vld [vmem:[#allocation5 + $0xc0] sm:$0xff]  ;;  %v54_v16 = vld [vmem:[#allocation5 + $0x38] sm:$0xff] }
  0x11   :  { %105 = vmatpush.msra.mxu1 %v76_v5  ;;  %v70_v17 = vld [vmem:[#allocation5 + $0xb8] sm:$0xff]  ;;  %v53_v18 = vld [vmem:[#allocation5 + $0x30] sm:$0xff]  ;;  %v52_v20 = vld [vmem:[#allocation5 + $0x28] sm:$0xff] }
  0x12   :  { %86 = vmatpush.msra.mxu0 %v59_v6  ;;  %v69_v19 = vld [vmem:[#allocation5 + $0xb0] sm:$0xff]  ;;  %v68_v21 = vld [vmem:[#allocation5 + $0xa8] sm:$0xff]  ;;  %v51_v22 = vld [vmem:[#allocation5 + $0x20] sm:$0xff] }
  0x13   :  { %106 = vmatpush.msra.mxu1 %v75_v7  ;;  %v67_v23 = vld [vmem:[#allocation5 + $0xa0] sm:$0xff]  ;;  %v50_v24 = vld [vmem:[#allocation5 + $0x18] sm:$0xff]  ;;  %v49_v26 = vld [vmem:[#allocation5 + $0x10] sm:$0xff] }
  0x14   :  { %87 = vmatpush.msra.mxu0 %v58_v8  ;;  %v66_v25 = vld [vmem:[#allocation5 + $0x98] sm:$0xff]  ;;  %v65_v27 = vld [vmem:[#allocation5 + $0x90] sm:$0xff]  ;;  %v48_v28 = vld [vmem:[#allocation5 + $0x8] sm:$0xff] }
  0x15   :  { %107 = vmatpush.msra.mxu1 %v74_v9  ;;  %v64_v29 = vld [vmem:[#allocation5 + $0x88] sm:$0xff]  ;;  %v47_v30 = vld [vmem:[#allocation5] sm:$0xff]  ;;  %v45_v32 = vld [vmem:[#allocation2] sm:$0xff] }
  0x16   :  { %88 = vmatpush.msra.mxu0 %v57_v10  ;;  %v63_v31 = vld [vmem:[#allocation5 + $0x80] sm:$0xff]  ;;  %v46_v33 = vld [vmem:[#allocation2 + $0x8] sm:$0xff]  ;;  %v152_v34 = vld [vmem:[%s270_s2] ss:$0 sm:$0xff] }
  0x17   :  { %108 = vmatpush.msra.mxu1 %v73_v11 }
  0x18   :  { %89 = vmatpush.msra.mxu0 %v56_v12 }
  0x19   :  { %109 = vmatpush.msra.mxu1 %v72_v13 }
  0x1a   :  { %90 = vmatpush.msra.mxu0 %v55_v14 }
  0x1b   :  { %110 = vmatpush.msra.mxu1 %v71_v15 }
  0x1c   :  { %91 = vmatpush.msra.mxu0 %v54_v16 }
  0x1d   :  { %111 = vmatpush.msra.mxu1 %v70_v17 }
  0x1e   :  { %92 = vmatpush.msra.mxu0 %v53_v18 }
  0x1f   :  { %112 = vmatpush.msra.mxu1 %v69_v19 }
  0x20   :  { %93 = vmatpush.msra.mxu0 %v52_v20 }
  0x21   :  { %113 = vmatpush.msra.mxu1 %v68_v21 }
  0x22   :  { %94 = vmatpush.msra.mxu0 %v51_v22 }
  0x23   :  { %114 = vmatpush.msra.mxu1 %v67_v23 }
  0x24   :  { %95 = vmatpush.msra.mxu0 %v50_v24 }
  0x25   :  { %115 = vmatpush.msra.mxu1 %v66_v25 }
  0x26   :  { %96 = vmatpush.msra.mxu0 %v49_v26 }
  0x27   :  { %116 = vmatpush.msra.mxu1 %v65_v27 }
  0x28   :  { %97 = vmatpush.msra.mxu0 %v48_v28 }
  0x29   :  { %117 = vmatpush.msra.mxu1 %v64_v29 }
  0x2a   :  { %98 = vmatpush.msra.mxu0 %v47_v30 }
  0x2b   :  { %118 = vmatpush.msra.mxu1 %v63_v31  ;;  %99 = vmatmul.f32.vlgmr.msra.gmra.mxu0 %v45_v32 }
  0x2c   :  { %119 = vmatmul.f32.vlgmr.msra.gmra.mxu1 %v46_v33 }
  0xa8   :  { %v100_v35 = vpop.f32.mrf.mxu0 }
  0xa9   :  { %v120_v36 = vpop.f32.mrf.mxu1  ;;  %v101_v37 = vadd.f32 %v152_v34, %v100_v35 }
  0xab   :  { %v121_v38 = vadd.f32 %v120_v36, %v101_v37 }
  0xad   :  { %v123_v39 = vadd.f32 3.0, %v121_v38 }
  0xaf   :  { %v124_v40 = vmax.f32 %v123_v39, 0.0 }
  0xb1   :  { %v125_v41 = vmin.f32 %v124_v40, 6.0 }
  0xb3   :  { %v126_v42 = vmul.f32 %v125_v41, %v121_v38 }
  0xb5   :  { %v127_v43 = vmul.f32 0.16666667, %v126_v42 }
  0xb7   :  { %128 = vst [vmem:[#allocation7] sm:$0xff] %v127_v43 }
  0xb8   :  { %139 = dma.vmem_to_hbm [thread:$0]  %s135_s25, 128, %s137_s28, [#allocation4]  }
  0xb9   :  { %229 = dma.done.wait [#allocation4], 128  }
  0xba   :  { %230 = vsyncadd [#allocation4], 4294967168 }
  0xbb   :  { %144 = vsyncpa [#allocation3], 1 }
  0xbc   :  { %145 = vsyncpa [#allocation6], 1 }
  0xbd   :  { %146 = vsyncpa [#allocation4], 1 }

</bundles_post_ra>
